<compile_context>
chip_gen: v7x
topology: tpu7x:2x2x1
jax: 0.10.0
libtpu: 0.0.40
codegen_flags: <defaults>
</compile_context>

<pallas_src>
import functools

import jax
import jax.numpy as jnp
from jax.experimental import pallas as pl
from jax.experimental.pallas import tpu as pltpu


def hw_kernel(x_ref, h_ref, dgt_ref, wft_ref, bft_ref, o_ref, *, s, mu):
    x = x_ref[...]                      # (TB, 2*ln)  natural layout
    h = h_ref[...]                      # (TB, s)     natural layout

    # Both Linears in one MXU pass, contracted directly against the natural X
    # block (A·Bᵀ contraction: no wrapper-side or in-kernel transpose of X),
    # then a single tanh over the lane-dense slab.
    slab = jnp.tanh(
        jax.lax.dot_general(
            wft_ref[...], x,
            dimension_numbers=(((1,), (1,)), ((), ())),
            preferred_element_type=jnp.float32,
        )
        + bft_ref[...]
    )                                   # (s*s + s, TB)
    xi_t = slab[: s * s, :]             # (s*s, TB): row i*s+j == Xi(X)[:, i, j]
    rou_t = slab[s * s:, :]             # (s, TB)  == Rou(X[:, :ln])^T

    # H^T via a tiny identity matmul on the idle MXU — same A·Bᵀ contraction
    # as above; avoids any wrapper/XLU transpose of a narrow (TB, s) tile.
    rr = jax.lax.broadcasted_iota(jnp.int32, (s, s), 0)
    cc = jax.lax.broadcasted_iota(jnp.int32, (s, s), 1)
    eye = (rr == cc).astype(jnp.float32)
    ht = jax.lax.dot_general(
        eye, h,
        dimension_numbers=(((1,), (1,)), ((), ())),
        preferred_element_type=jnp.float32,
    )                                   # (s, TB) == H^T

    # Batched mat-vec (Xi(X) @ H): s aligned 8-sublane slices * H^T, each with
    # a sublane (XLU) reduction — no (s*s, TB) h_rep / prod intermediates.
    rows = [
        jnp.sum(xi_t[i * s:(i + 1) * s, :] * ht, axis=0, keepdims=True)
        for i in range(s)
    ]
    av = jnp.concatenate(rows, axis=0)  # (s, TB)

    # (mu/s)/dg folded into one per-column scale (exact reciprocal: 1e-5 tol).
    scale = (mu / s) * pl.reciprocal(dgt_ref[...], approx=False)  # (1, TB)
    o_ref[...] = scale * av + rou_t                               # lane-dense store


def _round_up(x, m):
    return (x + m - 1) // m * m


def hw_forward(X, H, dg, W_xi, b_xi, W_rou, b_rou, *, ln, s, mu=0.9,
               block_rows=8192, transposed_output=False):
    """X:(bs,2*ln), H:(bs,s), dg:(bs,1); weights pre-transposed to (in,out)."""
    f32 = jnp.float32
    bs = X.shape[0]
    X = X.astype(f32)
    H = H.astype(f32)
    dg = jnp.reshape(dg, (bs, 1)).astype(f32)

    # ---- fuse the two Linears into one (s*s+s, 2*ln) weight (transposed) ----
    W_rou_pad = jnp.pad(W_rou.astype(f32), ((0, ln), (0, 0)))             # rows ln: are zero
    W_fused_t = jnp.concatenate([W_xi.astype(f32), W_rou_pad], axis=1).T  # (s*s+s, 2*ln)
    b_fused_t = jnp.concatenate([b_xi.astype(f32), b_rou.astype(f32)], axis=1).T  # (s*s+s, 1)

    # ---- batch tiling: X/H stay in natural layout; tile is a multiple of 128 ----
    bs_pad = _round_up(bs, 128)
    tb = _round_up(min(block_rows, bs_pad), 128)
    if bs_pad >= 4096:                        # give both v7x TensorCores work (>=2 steps)
        tb = min(tb, _round_up(pl.cdiv(bs_pad, 2), 128))
    # prefer a tile that divides the 128-padded batch: avoids tile-padding X,
    # which would cost a full extra HBM round-trip in the wrapper.
    cand = tb
    while cand >= 128 and bs_pad % cand:
        cand -= 128
    if cand >= max(128, tb // 2) and bs_pad % cand == 0:
        tb = cand
    else:
        bs_pad = _round_up(bs_pad, tb)

    pad = bs_pad - bs
    Xp = jnp.pad(X, ((0, pad), (0, 0)))                                   # (bs_pad, 2*ln)
    Hp = jnp.pad(H, ((0, pad), (0, 0)))                                   # (bs_pad, s)
    dgt = jnp.pad(dg, ((0, pad), (0, 0)), constant_values=1.0).T          # (1, bs_pad); pad=1.0

    grid = (bs_pad // tb,)
    kernel = functools.partial(hw_kernel, s=s, mu=mu)

    nb = 4  # f32 bytes
    cost = pl.CostEstimate(
        flops=int(bs_pad * (2 * (s * s + s) * (2 * ln) + 4 * s * s + 4 * s)),
        transcendentals=int(bs_pad * (s * s + s + 1)),
        bytes_accessed=int(bs_pad * nb * (2 * ln + 2 * s + 1)
                           + (s * s + s) * (2 * ln + 1) * nb),
    )

    out_t = pl.pallas_call(
        kernel,
        out_shape=jax.ShapeDtypeStruct((s, bs_pad), f32),
        grid=grid,
        in_specs=[
            pl.BlockSpec((tb, 2 * ln), lambda i: (i, 0)),        # X  (natural layout)
            pl.BlockSpec((tb, s), lambda i: (i, 0)),             # H  (natural layout)
            pl.BlockSpec((1, tb), lambda i: (0, i)),             # dg^T (tiny)
            pl.BlockSpec((s * s + s, 2 * ln), lambda i: (0, 0)),  # fused W^T (VMEM resident)
            pl.BlockSpec((s * s + s, 1), lambda i: (0, 0)),       # fused b^T (VMEM resident)
        ],
        out_specs=pl.BlockSpec((s, tb), lambda i: (0, i)),       # lane-dense out^T
        compiler_params=pltpu.CompilerParams(
            dimension_semantics=("parallel",),
            # above the 16/32 MiB scoped defaults, below v7x's 64 MiB physical
            vmem_limit_bytes=48 * 1024 * 1024,
        ),
        cost_estimate=cost,
    )(Xp, Hp, dgt, W_fused_t, b_fused_t)

    if transposed_output:
        # (s, bs_pad): consumers that can use batch-on-lanes directly avoid the
        # extra HBM slice+transpose pass; valid columns are [:, :bs].
        return out_t
    return out_t[:, :bs].T                                                # (bs, s)


def hw_reference(X, H, dg, W_xi, b_xi, W_rou, b_rou, *, ln, s, mu=0.9):
    bs = X.shape[0]
    xi = jnp.tanh(X @ W_xi + b_xi).reshape(bs, s, s)
    A = xi * mu / s / dg.reshape(-1, 1, 1)
    b = jnp.tanh(X[:, :ln] @ W_rou + b_rou)
    return jnp.squeeze(A @ H[:, :, None], -1) + b


if __name__ == "__main__":
    ln, s, mu = 16, 8, 0.9
    bs = 200  # small, non-multiple of 128: exercises padding

    key = jax.random.PRNGKey(0)
    kx, kh, kd, kw1, kb1, kw2, kb2 = jax.random.split(key, 7)

    X = jax.random.normal(kx, (bs, 2 * ln), dtype=jnp.float32)
    H = jax.random.normal(kh, (bs, s), dtype=jnp.float32)
    dg = jax.random.randint(kd, (bs, 1), 1, 6).astype(jnp.float32)

    # nn.Linear(in, out) has weight (out, in); stored here pre-transposed (in, out).
    W_xi = 0.1 * jax.random.normal(kw1, (2 * ln, s * s), dtype=jnp.float32)
    b_xi = 0.1 * jax.random.normal(kb1, (1, s * s), dtype=jnp.float32)
    W_rou = 0.1 * jax.random.normal(kw2, (ln, s), dtype=jnp.float32)
    b_rou = 0.1 * jax.random.normal(kb2, (1, s), dtype=jnp.float32)

    out = hw_forward(X, H, dg, W_xi, b_xi, W_rou, b_rou, ln=ln, s=s, mu=mu)
    out = jax.block_until_ready(out)

    ref = hw_reference(X, H, dg, W_xi, b_xi, W_rou, b_rou, ln=ln, s=s, mu=mu)
    assert out.shape == (bs, s)
    assert jnp.allclose(out, ref, atol=1e-5, rtol=1e-5), "mismatch vs reference"

    print("KERNEL_OK")
</pallas_src>

<mosaic_0001>
module attributes {stable_mosaic.version = 11 : i64} {
  func.func @hw_kernel(%arg0: i32, %arg1: memref<256x32xf32, #tpu.memory_space<vmem>>, %arg2: memref<256x8xf32, #tpu.memory_space<vmem>>, %arg3: memref<1x256xf32, #tpu.memory_space<vmem>>, %arg4: memref<72x32xf32, #tpu.memory_space<vmem>>, %arg5: memref<72x1xf32, #tpu.memory_space<vmem>>, %arg6: memref<8x256xf32, #tpu.memory_space<vmem>>) attributes {dimension_semantics = [#tpu.dimension_semantics<parallel>], iteration_bounds = array<i64: 1>, scalar_prefetch = 0 : i64, scratch_operands = 0 : i64, tpu.core_type = #tpu.core_type<tc>, window_params = [{transform_indices = @transform_0, window_bounds = array<i64: 256, 32>}, {transform_indices = @transform_1, window_bounds = array<i64: 256, 8>}, {transform_indices = @transform_2, window_bounds = array<i64: 1, 256>}, {pipeline_mode = #tpu.pipeline_mode<synchronous>, transform_indices = @transform_3, window_bounds = array<i64: 72, 32>}, {pipeline_mode = #tpu.pipeline_mode<synchronous>, transform_indices = @transform_4, window_bounds = array<i64: 72, 1>}, {transform_indices = @transform_5, window_bounds = array<i64: 8, 256>}]} {
    %c0 = arith.constant 0 : index
    %c0_0 = arith.constant 0 : index
    %0 = vector.load %arg1[%c0, %c0_0] : memref<256x32xf32, #tpu.memory_space<vmem>>, vector<256x32xf32>
    %c0_1 = arith.constant 0 : index
    %c0_2 = arith.constant 0 : index
    %1 = vector.load %arg2[%c0_1, %c0_2] : memref<256x8xf32, #tpu.memory_space<vmem>>, vector<256x8xf32>
    %c0_3 = arith.constant 0 : index
    %c0_4 = arith.constant 0 : index
    %2 = vector.load %arg4[%c0_3, %c0_4] : memref<72x32xf32, #tpu.memory_space<vmem>>, vector<72x32xf32>
    %cst = arith.constant dense<0.000000e+00> : vector<72x256xf32>
    %3 = tpu.matmul %2, %0, %cst {dimension_numbers = #tpu.dot_dimension_numbers<[1], [1], [0], [0], [0, 0, 1, 0], [], []>} : vector<72x32xf32>, vector<256x32xf32>, vector<72x256xf32> -> vector<72x256xf32>
    %c0_5 = arith.constant 0 : index
    %c0_6 = arith.constant 0 : index
    %4 = vector.load %arg5[%c0_5, %c0_6] : memref<72x1xf32, #tpu.memory_space<vmem>>, vector<72x1xf32>
    %5 = vector.broadcast %4 : vector<72x1xf32> to vector<72x256xf32>
    %6 = arith.addf %3, %5 : vector<72x256xf32>
    %7 = math.tanh %6 : vector<72x256xf32>
    %8 = vector.extract_strided_slice %7 {offsets = [0, 0], sizes = [64, 256], strides = [1, 1]} : vector<72x256xf32> to vector<64x256xf32>
    %9 = vector.extract_strided_slice %7 {offsets = [64, 0], sizes = [8, 256], strides = [1, 1]} : vector<72x256xf32> to vector<8x256xf32>
    %10 = tpu.iota {dimensions = array<i32: 0>} : vector<8x8xi32>
    %11 = tpu.iota {dimensions = array<i32: 1>} : vector<8x8xi32>
    %12 = arith.cmpi eq, %10, %11 : vector<8x8xi32>
    %13 = arith.extui %12 : vector<8x8xi1> to vector<8x8xi32>
    %14 = arith.sitofp %13 : vector<8x8xi32> to vector<8x8xf32>
    %cst_7 = arith.constant dense<0.000000e+00> : vector<8x256xf32>
    %15 = tpu.matmul %14, %1, %cst_7 {dimension_numbers = #tpu.dot_dimension_numbers<[1], [1], [0], [0], [0, 0, 1, 0], [], []>} : vector<8x8xf32>, vector<256x8xf32>, vector<8x256xf32> -> vector<8x256xf32>
    %16 = vector.extract_strided_slice %8 {offsets = [0, 0], sizes = [8, 256], strides = [1, 1]} : vector<64x256xf32> to vector<8x256xf32>
    %17 = arith.mulf %16, %15 : vector<8x256xf32>
    %cst_8 = arith.constant dense<0.000000e+00> : vector<256xf32>
    %18 = vector.multi_reduction <add>, %17, %cst_8 [0] : vector<8x256xf32> to vector<256xf32>
    %19 = vector.shape_cast %18 : vector<256xf32> to vector<1x256xf32>
    %20 = vector.extract_strided_slice %8 {offsets = [8, 0], sizes = [8, 256], strides = [1, 1]} : vector<64x256xf32> to vector<8x256xf32>
    %21 = arith.mulf %20, %15 : vector<8x256xf32>
    %cst_9 = arith.constant dense<0.000000e+00> : vector<256xf32>
    %22 = vector.multi_reduction <add>, %21, %cst_9 [0] : vector<8x256xf32> to vector<256xf32>
    %23 = vector.shape_cast %22 : vector<256xf32> to vector<1x256xf32>
    %24 = vector.extract_strided_slice %8 {offsets = [16, 0], sizes = [8, 256], strides = [1, 1]} : vector<64x256xf32> to vector<8x256xf32>
    %25 = arith.mulf %24, %15 : vector<8x256xf32>
    %cst_10 = arith.constant dense<0.000000e+00> : vector<256xf32>
    %26 = vector.multi_reduction <add>, %25, %cst_10 [0] : vector<8x256xf32> to vector<256xf32>
    %27 = vector.shape_cast %26 : vector<256xf32> to vector<1x256xf32>
    %28 = vector.extract_strided_slice %8 {offsets = [24, 0], sizes = [8, 256], strides = [1, 1]} : vector<64x256xf32> to vector<8x256xf32>
    %29 = arith.mulf %28, %15 : vector<8x256xf32>
    %cst_11 = arith.constant dense<0.000000e+00> : vector<256xf32>
    %30 = vector.multi_reduction <add>, %29, %cst_11 [0] : vector<8x256xf32> to vector<256xf32>
    %31 = vector.shape_cast %30 : vector<256xf32> to vector<1x256xf32>
    %32 = vector.extract_strided_slice %8 {offsets = [32, 0], sizes = [8, 256], strides = [1, 1]} : vector<64x256xf32> to vector<8x256xf32>
    %33 = arith.mulf %32, %15 : vector<8x256xf32>
    %cst_12 = arith.constant dense<0.000000e+00> : vector<256xf32>
    %34 = vector.multi_reduction <add>, %33, %cst_12 [0] : vector<8x256xf32> to vector<256xf32>
    %35 = vector.shape_cast %34 : vector<256xf32> to vector<1x256xf32>
    %36 = vector.extract_strided_slice %8 {offsets = [40, 0], sizes = [8, 256], strides = [1, 1]} : vector<64x256xf32> to vector<8x256xf32>
    %37 = arith.mulf %36, %15 : vector<8x256xf32>
    %cst_13 = arith.constant dense<0.000000e+00> : vector<256xf32>
    %38 = vector.multi_reduction <add>, %37, %cst_13 [0] : vector<8x256xf32> to vector<256xf32>
    %39 = vector.shape_cast %38 : vector<256xf32> to vector<1x256xf32>
    %40 = vector.extract_strided_slice %8 {offsets = [48, 0], sizes = [8, 256], strides = [1, 1]} : vector<64x256xf32> to vector<8x256xf32>
    %41 = arith.mulf %40, %15 : vector<8x256xf32>
    %cst_14 = arith.constant dense<0.000000e+00> : vector<256xf32>
    %42 = vector.multi_reduction <add>, %41, %cst_14 [0] : vector<8x256xf32> to vector<256xf32>
    %43 = vector.shape_cast %42 : vector<256xf32> to vector<1x256xf32>
    %44 = vector.extract_strided_slice %8 {offsets = [56, 0], sizes = [8, 256], strides = [1, 1]} : vector<64x256xf32> to vector<8x256xf32>
    %45 = arith.mulf %44, %15 : vector<8x256xf32>
    %cst_15 = arith.constant dense<0.000000e+00> : vector<256xf32>
    %46 = vector.multi_reduction <add>, %45, %cst_15 [0] : vector<8x256xf32> to vector<256xf32>
    %47 = vector.shape_cast %46 : vector<256xf32> to vector<1x256xf32>
    %48 = tpu.concatenate %19, %23, %27, %31, %35, %39, %43, %47 in 0 : vector<1x256xf32>, vector<1x256xf32>, vector<1x256xf32>, vector<1x256xf32>, vector<1x256xf32>, vector<1x256xf32>, vector<1x256xf32>, vector<1x256xf32> -> vector<8x256xf32>
    %c0_16 = arith.constant 0 : index
    %c0_17 = arith.constant 0 : index
    %49 = vector.load %arg3[%c0_16, %c0_17] : memref<1x256xf32, #tpu.memory_space<vmem>>, vector<1x256xf32>
    %50 = tpu.reciprocal %49 : vector<1x256xf32> -> vector<1x256xf32>
    %cst_18 = arith.constant 1.125000e-01 : f32
    %51 = vector.broadcast %cst_18 : f32 to vector<1x256xf32>
    %52 = arith.mulf %51, %50 : vector<1x256xf32>
    %53 = vector.broadcast %52 : vector<1x256xf32> to vector<8x256xf32>
    %54 = arith.mulf %53, %48 : vector<8x256xf32>
    %55 = arith.addf %54, %9 : vector<8x256xf32>
    %c0_19 = arith.constant 0 : index
    %c0_20 = arith.constant 0 : index
    %56 = vector.load %arg6[%c0_19, %c0_20] : memref<8x256xf32, #tpu.memory_space<vmem>>, vector<8x256xf32>
    tpu.vector_store %arg6[%c0_19, %c0_20], %55 {strides = array<i32>} : memref<8x256xf32, #tpu.memory_space<vmem>>, vector<8x256xf32>,
    return
  }
  func.func @transform_0(%arg0: i32) -> (i32, i32) {
    %c0_i32 = arith.constant 0 : i32
    %c0_i32_0 = arith.constant 0 : i32
    return %arg0, %c0_i32 : i32, i32
  }
  func.func @transform_1(%arg0: i32) -> (i32, i32) {
    %c0_i32 = arith.constant 0 : i32
    %c0_i32_0 = arith.constant 0 : i32
    return %arg0, %c0_i32 : i32, i32
  }
  func.func @transform_2(%arg0: i32) -> (i32, i32) {
    %c0_i32 = arith.constant 0 : i32
    %c0_i32_0 = arith.constant 0 : i32
    return %c0_i32, %arg0 : i32, i32
  }
  func.func @transform_3(%arg0: i32) -> (i32, i32) {
    %c0_i32 = arith.constant 0 : i32
    %c0_i32_0 = arith.constant 0 : i32
    %c0_i32_1 = arith.constant 0 : i32
    return %c0_i32, %c0_i32_0 : i32, i32
  }
  func.func @transform_4(%arg0: i32) -> (i32, i32) {
    %c0_i32 = arith.constant 0 : i32
    %c0_i32_0 = arith.constant 0 : i32
    %c0_i32_1 = arith.constant 0 : i32
    return %c0_i32, %c0_i32_0 : i32, i32
  }
  func.func @transform_5(%arg0: i32) -> (i32, i32) {
    %c0_i32 = arith.constant 0 : i32
    %c0_i32_0 = arith.constant 0 : i32
    return %c0_i32, %arg0 : i32, i32
  }
}

</mosaic_0001>

<bundles_post_ra>
// kernel: tpu_custom_call.1
= control target key start
LH: loop header
LB: loop body
LE: loop exit
PB: predicated region body
PF: predicated region fallthrough
CT: control target
= control target key end

     0   :  { %vm148_vm0 = vcmask 261120   ;;  %vm416_vm1 = vcmask 64512   ;;  %v409_v3 = vlaneseq  ;;  %v1076_v12 = vmov 0   ;;  %s1531_s0 = inlined_call_operand.vmem [shape: f32[256,32], index: 0, kind: input, shape index: {}]   ;;  %s1532_s1 = inlined_call_operand.vmem [shape: f32[256,8], index: 1, kind: input, shape index: {}]   ;;  %s1533_s2 = inlined_call_operand.vmem [shape: f32[1,256], index: 2, kind: input, shape index: {}]   ;;  %s1534_s3 = inlined_call_operand.vmem [shape: f32[72,32], index: 3, kind: input, shape index: {}]   ;;  %s1535_s4 = inlined_call_operand.vmem [shape: f32[72,1], index: 4, kind: input, shape index: {}]   ;;  %s1536_s5 = inlined_call_operand.hbm [shape: f32[8,256], index: 5, kind: output, shape index: {}]  }
   0x1   :  { %v37_v0 = vld [vmem:[%s1531_s0 + $0x80] sm:$0xff]  ;;  %v38_v1 = vld [vmem:[%s1531_s0 + $0x88] sm:$0xff]  ;;  %vm1120_vm2 = vmpackc.low %vm148_vm0, %vm148_vm0  ;;  %1012 = vset.pattern.permute.xlu0 %v1076_v12  ;;  %1013 = vset.pattern.permute.xlu1 %v1076_v12  ;;  %v1077_v24 = vmov 0.0  }
   0x2   :  { %v21_v2 = vld [vmem:[%s1531_s0] sm:$0xff]  ;;  %v913_v4 = vpack.c.bf16 %v38_v1, %v37_v0  ;;  %v22_v6 = vld [vmem:[%s1531_s0 + $0x8] sm:$0xff]  ;;  %v39_v7 = vld [vmem:[%s1531_s0 + $0x90] sm:$0xff]  ;;  %v1133_v10 = vshrl.u32 %v409_v3, 7  ;;  %v412_v11 = vand.u32 127, %v409_v3 }
   0x3   :  { %v916_v8 = vpack.c.bf16 %v22_v6, %v21_v2  ;;  %v40_v9 = vld [vmem:[%s1531_s0 + $0x98] sm:$0xff]  ;;  %v69_v14 = vld [vmem:[%s1532_s1 + $0x80] sm:$0xff]  ;;  %v70_v15 = vld [vmem:[%s1532_s1 + $0x88] sm:$0xff] }
   0x4   :  { %915 = vmatprep.subr.msk.bf16.mxu0 %vm1120_vm2, %v913_v4  ;;  %v919_v13 = vpack.c.bf16 %v40_v9, %v39_v7  ;;  %vm1145_vm3 = vmpackc.low %vm416_vm1, %vm416_vm1  ;;  %v961_v17 = vpack.c.bf16 %v70_v15, %v69_v14  ;;  %v53_v18 = vld [vmem:[%s1532_s1] sm:$0xff]  ;;  %v54_v19 = vld [vmem:[%s1532_s1 + $0x8] sm:$0xff]  ;;  %vm413_vm4 = vcmp.eq.s32.totalorder %v1133_v10, %v412_v11 }
   0x5   :  { %918 = vmatpush3.bf16.xpose.msk.msra.mxu0 %vm1120_vm2, %v916_v8  ;;  %v23_v20 = vld [vmem:[%s1531_s0 + $0x10] sm:$0xff]  ;;  %v24_v21 = vld [vmem:[%s1531_s0 + $0x18] sm:$0xff]  ;;  %v964_v22 = vpack.c.bf16 %v54_v19, %v53_v18  ;;  %v41_v23 = vld [vmem:[%s1531_s0 + $0xa0] sm:$0xff]  ;;  %v1169_v25 = vsel %vm413_vm4, 1.0, %v1077_v24 }
   0x6   :  { %921 = vmatprep.subr.msk.bf16.mxu0 %vm1120_vm2, %v919_v13  ;;  %963 = vmatprep.subr.msk.bf16.mxu1 %vm1145_vm3, %v961_v17  ;;  %v42_v26 = vld [vmem:[%s1531_s0 + $0xa8] sm:$0xff]  ;;  %v71_v27 = vld [vmem:[%s1532_s1 + $0x90] sm:$0xff]  ;;  %v72_v28 = vld [vmem:[%s1532_s1 + $0x98] sm:$0xff]  ;;  %v922_v30 = vpack.c.bf16 %v24_v21, %v23_v20 }
   0x7   :  { %911 = vmatprep.mubr.msk.f32.mxu1 %vm416_vm1, %v1169_v25  ;;  %966 = vmatpush3.bf16.xpose.msk.msra.mxu1 %vm1145_vm3, %v964_v22  ;;  %v967_v29 = vpack.c.bf16 %v72_v28, %v71_v27  ;;  %v55_v31 = vld [vmem:[%s1532_s1 + $0x10] sm:$0xff]  ;;  %v56_v32 = vld [vmem:[%s1532_s1 + $0x18] sm:$0xff]  ;;  %v925_v33 = vpack.c.bf16 %v42_v26, %v41_v23  ;;  %v73_v34 = vld [vmem:[%s1532_s1 + $0xa0] sm:$0xff] }
   0x8   :  { %v74_v35 = vld [vmem:[%s1532_s1 + $0xa8] sm:$0xff]  ;;  %v970_v36 = vpack.c.bf16 %v56_v32, %v55_v31  ;;  %v25_v38 = vld [vmem:[%s1531_s0 + $0x20] sm:$0xff]  ;;  %v43_v40 = vld [vmem:[%s1531_s0 + $0xb0] sm:$0xff] }
   0x9   :  { %969 = vmatprep.subr.msk.bf16.mxu1 %vm1145_vm3, %v967_v29  ;;  %v973_v37 = vpack.c.bf16 %v74_v35, %v73_v34  ;;  %v26_v39 = vld [vmem:[%s1531_s0 + $0x28] sm:$0xff]  ;;  %v44_v41 = vld [vmem:[%s1531_s0 + $0xb8] sm:$0xff]  ;;  %v57_v43 = vld [vmem:[%s1532_s1 + $0x20] sm:$0xff] }
   0xa   :  { %v928_v42 = vpack.c.bf16 %v26_v39, %v25_v38  ;;  %v58_v44 = vld [vmem:[%s1532_s1 + $0x28] sm:$0xff]  ;;  %v931_v45 = vpack.c.bf16 %v44_v41, %v43_v40  ;;  %v75_v46 = vld [vmem:[%s1532_s1 + $0xb0] sm:$0xff]  ;;  %v76_v47 = vld [vmem:[%s1532_s1 + $0xb8] sm:$0xff] }
   0xb   :  { %v976_v48 = vpack.c.bf16 %v58_v44, %v57_v43  ;;  %v979_v49 = vpack.c.bf16 %v76_v47, %v75_v46  ;;  %v1237_v50 = vld [vmem:[%s1534_s3] sm:$0xff]  ;;  %v27_v51 = vld [vmem:[%s1531_s0 + $0x30] sm:$0xff]  ;;  %v28_v52 = vld [vmem:[%s1531_s0 + $0x38] sm:$0xff] }
   0xc   :  { %861 = vmatprep.mubr.msk.f32.mxu0 %vm148_vm0, %v1237_v50  ;;  %v45_v53 = vld [vmem:[%s1531_s0 + $0xc0] sm:$0xff]  ;;  %v46_v54 = vld [vmem:[%s1531_s0 + $0xc8] sm:$0xff]  ;;  %v934_v55 = vpack.c.bf16 %v28_v52, %v27_v51  ;;  %v59_v56 = vld [vmem:[%s1532_s1 + $0x30] sm:$0xff] }
   0xd   :  { %924 = vmatpush3.bf16.xpose.msk.msra.mxu0 %vm1120_vm2, %v922_v30  ;;  %v60_v57 = vld [vmem:[%s1532_s1 + $0x38] sm:$0xff]  ;;  %v77_v58 = vld [vmem:[%s1532_s1 + $0xc0] sm:$0xff]  ;;  %v937_v59 = vpack.c.bf16 %v46_v54, %v45_v53  ;;  %v78_v60 = vld [vmem:[%s1532_s1 + $0xc8] sm:$0xff] }
   0xe   :  { %927 = vmatprep.subr.msk.bf16.mxu0 %vm1120_vm2, %v925_v33  ;;  %v94_v61 = vld [vmem:[%s1535_s4] sm:$0xff]  ;;  %v96_v62 = vld [vmem:[%s1535_s4 + $0x10] sm:$0xff]  ;;  %v982_v63 = vpack.c.bf16 %v60_v57, %v59_v56  ;;  %v95_v0 = vld [vmem:[%s1535_s4 + $0x8] sm:$0xff]  ;;  %v985_v2 = vpack.c.bf16 %v78_v60, %v77_v58 }
   0xf   :  { %972 = vmatpush3.bf16.xpose.msk.msra.mxu1 %vm1145_vm3, %v970_v36  ;;  %105 = vperm.xlu0 %1012, %v94_v61   ;;  %v97_v1 = vld [vmem:[%s1535_s4 + $0x18] sm:$0xff] }
  0x10   :  { %975 = vmatprep.subr.msk.bf16.mxu1 %vm1145_vm3, %v973_v37  ;;  %115 = vperm.xlu1 %1013, %v96_v62  }
  0x15   :  { %930 = vmatpush3.bf16.xpose.msk.msra.mxu0 %vm1120_vm2, %v928_v42 }
  0x16   :  { %933 = vmatprep.subr.msk.bf16.mxu0 %vm1120_vm2, %v931_v45 }
  0x17   :  { %978 = vmatpush3.bf16.xpose.msk.msra.mxu1 %vm1145_vm3, %v976_v48 }
  0x18   :  { %981 = vmatprep.subr.msk.bf16.mxu1 %vm1145_vm3, %v979_v49 }
  0x1d   :  { %936 = vmatpush3.bf16.xpose.msk.msra.mxu0 %vm1120_vm2, %v934_v55 }
  0x1e   :  { %10 = vsyncpa [#allocation3], 0  ;;  %939 = vmatprep.subr.msk.bf16.mxu0 %vm1120_vm2, %v937_v59  ;;  %v29_v3 = vld [vmem:[%s1531_s0 + $0x40] sm:$0xff]  ;;  %v30_v4 = vld [vmem:[%s1531_s0 + $0x48] sm:$0xff]  ;;  %110 = vperm.xlu0 %1012, %v95_v0   ;;  %vm699_vm5 = vcmask 1040384   ;;  %vm702_vm6 = vcmask 1041408  }
  0x1f   :  { %v47_v6 = vld [vmem:[%s1531_s0 + $0xd0] sm:$0xff]  ;;  %v48_v7 = vld [vmem:[%s1531_s0 + $0xd8] sm:$0xff]  ;;  %120 = vperm.xlu1 %1013, %v97_v1   ;;  %984 = vmatpush3.bf16.xpose.msk.msra.mxu1 %vm1145_vm3, %v982_v63  ;;  %v98_v8 = vld [vmem:[%s1535_s4 + $0x20] sm:$0xff]  ;;  %v940_v11 = vpack.c.bf16 %v30_v4, %v29_v3  ;;  %vm705_vm7 = vcmask 1042432   ;;  %vm708_vm8 = vcmask 1043456   ;;  %vm711_vm9 = vcmask 1044480  }
  0x20   :  { %v99_v9 = vld [vmem:[%s1535_s4 + $0x28] sm:$0xff]  ;;  %987 = vmatprep.subr.msk.bf16.mxu1 %vm1145_vm3, %v985_v2  ;;  %v61_v12 = vld [vmem:[%s1532_s1 + $0x40] sm:$0xff]  ;;  %v943_v14 = vpack.c.bf16 %v48_v7, %v47_v6  ;;  %v79_v15 = vld [vmem:[%s1532_s1 + $0xd0] sm:$0xff]  ;;  %vm714_vm10 = vcmask 1045504   ;;  %vm717_vm11 = vcmask 1046528  }
  0x21   :  { %v62_v13 = vld [vmem:[%s1532_s1 + $0x48] sm:$0xff]  ;;  %v80_v17 = vld [vmem:[%s1532_s1 + $0xd8] sm:$0xff]  ;;  %v100_v19 = vld [vmem:[%s1535_s4 + $0x30] sm:$0xff] }
  0x22   :  { %125 = vperm.xlu0 %1012, %v98_v8   ;;  %v988_v18 = vpack.c.bf16 %v62_v13, %v61_v12  ;;  %v101_v20 = vld [vmem:[%s1535_s4 + $0x38] sm:$0xff]  ;;  %v991_v21 = vpack.c.bf16 %v80_v17, %v79_v15  ;;  %v31_v22 = vld [vmem:[%s1531_s0 + $0x50] sm:$0xff]  ;;  %v49_v24 = vld [vmem:[%s1531_s0 + $0xe0] sm:$0xff] }
  0x23   :  { %130 = vperm.xlu1 %1013, %v99_v9   ;;  %v32_v23 = vld [vmem:[%s1531_s0 + $0x58] sm:$0xff]  ;;  %v50_v26 = vld [vmem:[%s1531_s0 + $0xe8] sm:$0xff]  ;;  %v102_v27 = vld [vmem:[%s1535_s4 + $0x40] sm:$0xff] }
  0x24   :  { %v946_v28 = vpack.c.bf16 %v32_v23, %v31_v22  ;;  %v63_v29 = vld [vmem:[%s1532_s1 + $0x50] sm:$0xff]  ;;  %v64_v30 = vld [vmem:[%s1532_s1 + $0x58] sm:$0xff]  ;;  %v949_v31 = vpack.c.bf16 %v50_v26, %v49_v24  ;;  %v81_v32 = vld [vmem:[%s1532_s1 + $0xe0] sm:$0xff] }
  0x25   :  { %942 = vmatpush3.bf16.xpose.msk.msra.mxu0 %vm1120_vm2, %v940_v11  ;;  %v82_v33 = vld [vmem:[%s1532_s1 + $0xe8] sm:$0xff]  ;;  %v994_v34 = vpack.c.bf16 %v64_v30, %v63_v29  ;;  %v33_v36 = vld [vmem:[%s1531_s0 + $0x60] sm:$0xff]  ;;  %v51_v38 = vld [vmem:[%s1531_s0 + $0xf0] sm:$0xff] }
  0x26   :  { %945 = vmatprep.subr.msk.bf16.mxu0 %vm1120_vm2, %v943_v14  ;;  %135 = vperm.xlu0 %1012, %v100_v19   ;;  %v997_v35 = vpack.c.bf16 %v82_v33, %v81_v32  ;;  %v34_v37 = vld [vmem:[%s1531_s0 + $0x68] sm:$0xff]  ;;  %v52_v39 = vld [vmem:[%s1531_s0 + $0xf8] sm:$0xff]  ;;  %v65_v41 = vld [vmem:[%s1532_s1 + $0x60] sm:$0xff] }
  0x27   :  { %140 = vperm.xlu1 %1013, %v101_v20   ;;  %990 = vmatpush3.bf16.xpose.msk.msra.mxu1 %vm1145_vm3, %v988_v18  ;;  %v952_v40 = vpack.c.bf16 %v34_v37, %v33_v36  ;;  %v66_v42 = vld [vmem:[%s1532_s1 + $0x68] sm:$0xff]  ;;  %v955_v43 = vpack.c.bf16 %v52_v39, %v51_v38  ;;  %v83_v44 = vld [vmem:[%s1532_s1 + $0xf0] sm:$0xff]  ;;  %v84_v45 = vld [vmem:[%s1532_s1 + $0xf8] sm:$0xff] }
  0x28   :  { %993 = vmatprep.subr.msk.bf16.mxu1 %vm1145_vm3, %v991_v21  ;;  %v1000_v46 = vpack.c.bf16 %v66_v42, %v65_v41  ;;  %v1003_v47 = vpack.c.bf16 %v84_v45, %v83_v44  ;;  %v35_v48 = vld [vmem:[%s1531_s0 + $0x70] sm:$0xff]  ;;  %v36_v49 = vld [vmem:[%s1531_s0 + $0x78] sm:$0xff]  ;;  %v86_v55 = vld [vmem:[%s1534_s3 + $0x8] sm:$0xff] }
  0x29   :  { %v958_v51 = vpack.c.bf16 %v36_v49, %v35_v48  ;;  %v67_v52 = vld [vmem:[%s1532_s1 + $0x70] sm:$0xff]  ;;  %v68_v53 = vld [vmem:[%s1532_s1 + $0x78] sm:$0xff]  ;;  %v89_v16 = vld [vmem:[%s1534_s3 + $0x20] sm:$0xff] }
  0x2a   :  { %145 = vperm.xlu0 %1012, %v102_v27   ;;  %v1006_v54 = vpack.c.bf16 %v68_v53, %v67_v52  ;;  %v87_v56 = vld [vmem:[%s1534_s3 + $0x10] sm:$0xff]  ;;  %v88_v5 = vld [vmem:[%s1534_s3 + $0x18] sm:$0xff]  ;;  %v93_v58 = vld [vmem:[%s1534_s3 + $0x40] sm:$0xff]  ;;  %v726_v53 = vsub.s32 0, %v1133_v10 }
  0x2b   :  { %v92_v57 = vld [vmem:[%s1534_s3 + $0x38] sm:$0xff]  ;;  %v720_v14 = vld [vmem:[%s1533_s2] sm:$0x3]  ;;  %s1078_s2 = smov [#allocation2]  }
  0x2c   :  { %s746_s29 = sshll.u32 %s1078_s2, 4  ;;  %s747_s29 = int_to_ptr.vmem [resolvable:$true] %s746_s29 }
  0x2d   :  { %948 = vmatpush3.bf16.xpose.msk.msra.mxu0 %vm1120_vm2, %v946_v28  ;;  %s1052_s30 = scalar_lea.vmem %s747_s29, 256  ;;  %p1057_p1 = scmp.lt.s32.totalorder %s747_s29, %s747_s29 }
  0x2e   :  { %951 = vmatprep.subr.msk.bf16.mxu0 %vm1120_vm2, %v949_v31  ;;  %p1053_p0 = scmp.ne.s32.totalorder %s747_s29, %s1052_s30  ;;  %p1058_p2 = scmp.lt.s32.totalorder %s1052_s30, %s1052_s30 }
  0x2f   :  { %996 = vmatpush3.bf16.xpose.msk.msra.mxu1 %vm1145_vm3, %v994_v34 }
  0x30   :  { %999 = vmatprep.subr.msk.bf16.mxu1 %vm1145_vm3, %v997_v35  ;;  %p1059_p3 = por %p1058_p2, %p1057_p1 }
  0x32   :  { %p1060_p4 = pnand %p1059_p3, %p1053_p0 }
  0x35   :  { %954 = vmatpush3.bf16.xpose.msk.msra.mxu0 %vm1120_vm2, %v952_v40 }
  0x36   :  { %957 = vmatprep.subr.msk.bf16.mxu0 %vm1120_vm2, %v955_v43 }
  0x37   :  { %1002 = vmatpush3.bf16.xpose.msk.msra.mxu1 %vm1145_vm3, %v1000_v46 }
  0x38   :  { %1005 = vmatprep.subr.msk.bf16.mxu1 %vm1145_vm3, %v1003_v47 }
  0x3d   :  { %960 = vmatpush3.bf16.xpose.msk.msra.mxu0 %vm1120_vm2, %v958_v51 }
  0x3f   :  { %1008 = vmatpush3.bf16.xpose.msk.msra.mxu1 %vm1145_vm3, %v1006_v54 }
  0x44   :  { %862 = vmatmul.mubr.msk.f32.vlgmr.msra.gmra.mrb[0].mxu0 %vm148_vm0, %v1237_v50  ;;  %v91_v50 = vld [vmem:[%s1534_s3 + $0x30] sm:$0xff] }
  0x45   :  { %863 = vmatprep.mubr.msk.f32.mxu0 %vm148_vm0, %v86_v55 }
  0x46   :  { %912 = vmatmul.mubr.msk.f32.vlgmr.msra.gmra.mrb[0].mxu1 %vm416_vm1, %v1169_v25  ;;  %v90_v25 = vld [vmem:[%s1534_s3 + $0x28] sm:$0xff] }
  0x48   :  { %864 = vmatmul.mubr.msk.f32.gmra.mrb[2].mxu0 %vm148_vm0, %v86_v55 }
  0x49   :  { %865 = vmatprep.mubr.msk.f32.mxu0 %vm148_vm0, %v87_v56 }
  0x4c   :  { %866 = vmatmul.mubr.msk.f32.gmra.mrb[4].mxu0 %vm148_vm0, %v87_v56 }
  0x4d   :  { %867 = vmatprep.mubr.msk.f32.mxu0 %vm148_vm0, %v88_v5 }
  0x50   :  { %868 = vmatmul.mubr.msk.f32.gmra.mrb[6].mxu0 %vm148_vm0, %v88_v5 }
  0x51   :  { %869 = vmatprep.mubr.msk.f32.mxu0 %vm148_vm0, %v89_v16 }
  0x54   :  { %870 = vmatmul.mubr.msk.f32.gmra.mrb[8].mxu0 %vm148_vm0, %v89_v16 }
  0x55   :  { %871 = vmatprep.mubr.msk.f32.mxu0 %vm148_vm0, %v90_v25 }
  0x58   :  { %872 = vmatmul.mubr.msk.f32.gmra.mrb[10].mxu0 %vm148_vm0, %v90_v25 }
  0x59   :  { %873 = vmatprep.mubr.msk.f32.mxu0 %vm148_vm0, %v91_v50 }
  0x5c   :  { %874 = vmatmul.mubr.msk.f32.gmra.mrb[12].mxu0 %vm148_vm0, %v91_v50 }
  0x5d   :  { %875 = vmatprep.mubr.msk.f32.mxu0 %vm148_vm0, %v92_v57 }
  0x60   :  { %876 = vmatmul.mubr.msk.f32.gmra.mrb[14].mxu0 %vm148_vm0, %v92_v57 }
  0x61   :  { %877 = vmatprep.mubr.msk.f32.mxu0 %vm148_vm0, %v93_v58 }
  0x64   :  { %878 = vmatmul.mubr.msk.f32.gmra.mrb[16].mxu0 %vm148_vm0, %v93_v58 }
  0x8e   :  { %v106_v59 = vpop.permute.xlu0 %105 }
  0x8f   :  { %v116_v7 = vpop.permute.xlu1 %115 }
  0x9d   :  { %v111_v0 = vpop.permute.xlu0 %110 }
  0x9e   :  { %v121_v15 = vpop.permute.xlu1 %120 }
  0xa1   :  { %v126_v26 = vpop.permute.xlu0 %125 }
  0xa2   :  { %v131_v39 = vpop.permute.xlu1 %130 }
  0xa5   :  { %v136_v16 = vpop.permute.xlu0 %135 }
 0x117   :  { %v338_v60 = vpop.f32.mrb[0].mxu0 }
 0x118   :  { %v339_v61 = vadd.f32 %v338_v60, %v106_v59  ;;  %v340_v62 = vpop.f32.mrb[1].mxu0 }
 0x119   :  { %v341_v63 = vadd.f32 %v340_v62, %v106_v59  ;;  %v1462_v1 = vpop.f32.mrb[0].mxu1 }
 0x11a   :  { %1014 = vtanh.f32 %v339_v61  ;;  %v1464_v3 = vpop.f32.mrb[1].mxu1 }
 0x11b   :  { %1016 = vtanh.f32 %v341_v63  ;;  %v344_v2 = vpop.f32.mrb[2].mxu0 }
 0x11c   :  { %v345_v4 = vadd.f32 %v344_v2, %v111_v0  ;;  %v346_v6 = vpop.f32.mrb[3].mxu0 }
 0x11d   :  { %v347_v8 = vadd.f32 %v346_v6, %v111_v0 }
 0x11e   :  { %1018 = vtanh.f32 %v345_v4 }
 0x11f   :  { %1020 = vtanh.f32 %v347_v8  ;;  %v350_v9 = vpop.f32.mrb[4].mxu0 }
 0x120   :  { %v351_v11 = vadd.f32 %v350_v9, %v116_v7  ;;  %v352_v12 = vpop.f32.mrb[5].mxu0 }
 0x121   :  { %v353_v13 = vadd.f32 %v352_v12, %v116_v7 }
 0x122   :  { %1022 = vtanh.f32 %v351_v11 }
 0x123   :  { %1024 = vtanh.f32 %v353_v13  ;;  %v356_v17 = vpop.f32.mrb[6].mxu0 }
 0x124   :  { %v1015_v18 = vpop.eup %1014  ;;  %v357_v19 = vadd.f32 %v356_v17, %v121_v15  ;;  %v358_v20 = vpop.f32.mrb[7].mxu0  ;;  %1026 = vrcp.f32 %v720_v14 }
 0x125   :  { %v1017_v21 = vpop.eup %1016  ;;  %v359_v22 = vadd.f32 %v358_v20, %v121_v15  ;;  %v587_v23 = vmul.f32 %v1015_v18, %v1462_v1 }
 0x126   :  { %1028 = vtanh.f32 %v357_v19  ;;  %v588_v24 = vmul.f32 %v1017_v21, %v1464_v3 }
 0x127   :  { %1030 = vtanh.f32 %v359_v22  ;;  %v589_v27 = vrot.slane %v587_v23, 4  ;;  %v362_v28 = vpop.f32.mrb[8].mxu0 }
 0x128   :  { %v1019_v29 = vpop.eup %1018  ;;  %v595_v30 = vrot.slane %v588_v24, 4  ;;  %v363_v31 = vadd.f32 %v362_v28, %v126_v26  ;;  %v364_v32 = vpop.f32.mrb[9].mxu0 }
 0x129   :  { %v1021_v33 = vpop.eup %1020  ;;  %v590_v34 = vadd.f32 %v589_v27, %v587_v23  ;;  %v601_v35 = vmul.f32 %v1019_v29, %v1462_v1  ;;  %v365_v36 = vadd.f32 %v364_v32, %v126_v26  ;;  %v141_v23 = vpop.permute.xlu1 %140 }
 0x12a   :  { %v596_v37 = vadd.f32 %v595_v30, %v588_v24  ;;  %v602_v38 = vmul.f32 %v1021_v33, %v1464_v3  ;;  %1032 = vtanh.f32 %v363_v31 }
 0x12b   :  { %v591_v40 = vrot.slane %v590_v34, 2  ;;  %v603_v41 = vrot.slane %v601_v35, 4  ;;  %1034 = vtanh.f32 %v365_v36  ;;  %v368_v42 = vpop.f32.mrb[10].mxu0  ;;  %v146_v36 = vpop.permute.xlu0 %145 }
 0x12c   :  { %v1023_v43 = vpop.eup %1022  ;;  %v597_v44 = vrot.slane %v596_v37, 2  ;;  %v609_v45 = vrot.slane %v602_v38, 4  ;;  %v369_v46 = vadd.f32 %v368_v42, %v131_v39  ;;  %v370_v47 = vpop.f32.mrb[11].mxu0 }
 0x12d   :  { %v1025_v48 = vpop.eup %1024  ;;  %v604_v49 = vadd.f32 %v603_v41, %v601_v35  ;;  %v615_v51 = vmul.f32 %v1023_v43, %v1462_v1  ;;  %v371_v52 = vadd.f32 %v370_v47, %v131_v39  ;;  %v1476_v25 = vadd.f32 %v591_v40, %v590_v34 }
 0x12e   :  { %v598_v54 = vadd.f32 %v597_v44, %v596_v37  ;;  %v610_v55 = vadd.f32 %v609_v45, %v602_v38  ;;  %v616_v56 = vmul.f32 %v1025_v48, %v1464_v3  ;;  %1036 = vtanh.f32 %v369_v46  ;;  %v1027_v5 = vpop.eup %1026 }
 0x12f   :  { %v605_v50 = vrot.slane %v604_v49, 2  ;;  %v617_v57 = vrot.slane %v615_v51, 4  ;;  %1038 = vtanh.f32 %v371_v52  ;;  %v374_v58 = vpop.f32.mrb[12].mxu0  ;;  %v1482_v13 = vmul.f32 0.1125, %v1027_v5 }
 0x130   :  { %v1029_v59 = vpop.eup %1028  ;;  %v599_v60 = vrot.slane %v598_v54, 1  ;;  %v611_v61 = vrot.slane %v610_v55, 2  ;;  %v623_v62 = vrot.slane %v616_v56, 4  ;;  %v375_v63 = vadd.f32 %v374_v58, %v136_v16  ;;  %v376_v0 = vpop.f32.mrb[13].mxu0 }
 0x131   :  { %v1031_v2 = vpop.eup %1030  ;;  %v1478_v4 = vadd.f32 %v605_v50, %v604_v49  ;;  %v618_v6 = vadd.f32 %v617_v57, %v615_v51  ;;  %v629_v7 = vmul.f32 %v1029_v59, %v1462_v1  ;;  %v377_v8 = vadd.f32 %v376_v0, %v136_v16 }
 0x132   :  { %v612_v9 = vadd.f32 %v611_v61, %v610_v55  ;;  %v624_v11 = vadd.f32 %v623_v62, %v616_v56  ;;  %v630_v12 = vmul.f32 %v1031_v2, %v1464_v3  ;;  %v593_v14 = vrot.slane %v1476_v25, 1 }
 0x133   :  { %v619_v15 = vrot.slane %v618_v6, 2  ;;  %v631_v17 = vrot.slane %v629_v7, 4  ;;  %1040 = vtanh.f32 %v375_v63  ;;  %v380_v18 = vpop.f32.mrb[14].mxu0  ;;  %v1485_v20 = vadd.f32 %v599_v60, %v598_v54 }
 0x134   :  { %v1033_v19 = vpop.eup %1032  ;;  %v625_v21 = vrot.slane %v624_v11, 2  ;;  %v637_v22 = vrot.slane %v630_v12, 4  ;;  %1042 = vtanh.f32 %v377_v8  ;;  %v382_v24 = vpop.f32.mrb[15].mxu0  ;;  %v607_v27 = vrot.slane %v1478_v4, 1 }
 0x135   :  { %v1035_v26 = vpop.eup %1034  ;;  %v613_v28 = vrot.slane %v612_v9, 1  ;;  %v643_v29 = vmul.f32 %v1033_v19, %v1462_v1  ;;  %v381_v30 = vadd.f32 %v380_v18, %v141_v23  ;;  %v632_v31 = vadd.f32 %v631_v17, %v629_v7 }
 0x136   :  { %v626_v32 = vadd.f32 %v625_v21, %v624_v11  ;;  %v638_v33 = vadd.f32 %v637_v22, %v630_v12  ;;  %v644_v34 = vmul.f32 %v1035_v26, %v1464_v3  ;;  %v620_v35 = vadd.f32 %v619_v15, %v618_v6 }
 0x137   :  { %v645_v37 = vrot.slane %v643_v29, 4  ;;  %1044 = vtanh.f32 %v381_v30  ;;  %v383_v38 = vadd.f32 %v382_v24, %v141_v23  ;;  %v386_v39 = vpop.f32.mrb[16].mxu0  ;;  %v614_v47 = vadd.f32 %v613_v28, %v612_v9 }
 0x138   :  { %v1037_v40 = vpop.eup %1036  ;;  %v627_v41 = vrot.slane %v626_v32, 1  ;;  %v639_v42 = vrot.slane %v638_v33, 2  ;;  %v651_v43 = vrot.slane %v644_v34, 4  ;;  %v387_v44 = vadd.f32 %v386_v39, %v146_v36  ;;  %v388_v45 = vpop.f32.mrb[17].mxu0 }
 0x139   :  { %v1039_v46 = vpop.eup %1038  ;;  %v646_v48 = vadd.f32 %v645_v37, %v643_v29  ;;  %v657_v49 = vmul.f32 %v1037_v40, %v1462_v1  ;;  %1046 = vtanh.f32 %v383_v38  ;;  %v633_v51 = vrot.slane %v632_v31, 2 }
 0x13a   :  { %v640_v52 = vadd.f32 %v639_v42, %v638_v33  ;;  %v652_v54 = vadd.f32 %v651_v43, %v644_v34  ;;  %v658_v55 = vmul.f32 %v1039_v46, %v1464_v3  ;;  %v628_v56 = vadd.f32 %v627_v41, %v626_v32 }
 0x13b   :  { %v647_v5 = vrot.slane %v646_v48, 2  ;;  %v659_v16 = vrot.slane %v657_v49, 4  ;;  %v1492_v50 = vadd.f32 %v388_v45, %v146_v36  ;;  %1048 = vtanh.f32 %v387_v44 }
 0x13c   :  { %v653_v57 = vrot.slane %v652_v54, 2  ;;  %v665_v58 = vrot.slane %v658_v55, 4  ;;  %v594_v59 = vadd.f32 %v593_v14, %v1476_v25  ;;  %v641_v61 = vrot.slane %v640_v52, 1 }
 0x13d   :  { %v1041_v60 = vpop.eup %1040  ;;  %v648_v62 = vadd.f32 %v647_v5, %v646_v48  ;;  %v660_v63 = vadd.f32 %v659_v16, %v657_v49  ;;  %v621_v0 = vrot.slane %v620_v35, 1  ;;  %v634_v9 = vadd.f32 %v633_v51, %v632_v31 }
 0x13e   :  { %v1043_v2 = vpop.eup %1042  ;;  %v654_v6 = vadd.f32 %v653_v57, %v652_v54  ;;  %v666_v7 = vadd.f32 %v665_v58, %v658_v55  ;;  %v671_v8 = vmul.f32 %v1041_v60, %v1462_v1  ;;  %v608_v17 = vadd.f32 %v607_v27, %v1478_v4 }
 0x13f   :  { %v649_v11 = vrot.slane %v648_v62, 1  ;;  %v661_v12 = vrot.slane %v660_v63, 2  ;;  %v672_v15 = vmul.f32 %v1043_v2, %v1464_v3  ;;  %v622_v18 = vadd.f32 %v621_v0, %v620_v35 }
 0x140   :  { %v667_v25 = vrot.slane %v666_v7, 2  ;;  %v673_v14 = vrot.slane %v671_v8, 4  ;;  %v635_v19 = vrot.slane %v634_v9, 1  ;;  %v655_v23 = vrot.slane %v654_v6, 1 }
 0x141   :  { %v1045_v21 = vpop.eup %1044  ;;  %v650_v22 = vadd.f32 %v649_v11, %v648_v62  ;;  %v662_v24 = vadd.f32 %v661_v12, %v660_v63  ;;  %v679_v26 = vrot.slane %v672_v15, 4  ;;  %v642_v31 = vadd.f32 %v641_v61, %v640_v52 }
 0x142   :  { %v668_v28 = vadd.f32 %v667_v25, %v666_v7  ;;  %v674_v29 = vadd.f32 %v673_v14, %v671_v8  ;;  %v685_v30 = vmul.f32 %v1045_v21, %v1462_v1  ;;  %v636_v34 = vadd.f32 %v635_v19, %v634_v9 }
 0x143   :  { %v1047_v32 = vpop.eup %1046  ;;  %v680_v33 = vadd.f32 %v679_v26, %v672_v15  ;;  %v663_v4 = vrot.slane %v662_v24, 1  ;;  %v700_v27 = vsel %vm699_vm5, %v594_v59, %v608_v17  ;;  %v656_v39 = vadd.f32 %v655_v23, %v654_v6 }
 0x144   :  { %v675_v36 = vrot.slane %v674_v29, 2  ;;  %v687_v35 = vrot.slane %v685_v30, 4  ;;  %v686_v37 = vmul.f32 %v1047_v32, %v1464_v3  ;;  %v669_v38 = vrot.slane %v668_v28, 1 }
 0x145   :  { %v681_v40 = vrot.slane %v680_v33, 2  ;;  %v701_v41 = vsel %vm699_vm5, %v1485_v20, %v614_v47  ;;  %v703_v42 = vsel %vm702_vm6, %v700_v27, %v622_v18  ;;  %v1049_v1 = vpop.eup %1048  ;;  %v664_v45 = vadd.f32 %v663_v4, %v662_v24 }
 0x146   :  { %v688_v43 = vadd.f32 %v687_v35, %v685_v30  ;;  %v693_v44 = vrot.slane %v686_v37, 4  ;;  %v676_v46 = vadd.f32 %v675_v36, %v674_v29  ;;  %v670_v48 = vadd.f32 %v669_v38, %v668_v28 }
 0x147   :  { %v682_v49 = vadd.f32 %v681_v40, %v680_v33  ;;  %v704_v51 = vsel %vm702_vm6, %v701_v41, %v628_v56  ;;  %v706_v52 = vsel %vm705_vm7, %v703_v42, %v636_v34  ;;  %1050 = vtanh.f32 %v1492_v50 }
 0x148   :  { %v694_v3 = vadd.f32 %v693_v44, %v686_v37  ;;  %v677_v54 = vrot.slane %v676_v46, 1  ;;  %v689_v55 = vrot.slane %v688_v43, 2  ;;  %v707_v5 = vsel %vm705_vm7, %v704_v51, %v642_v31 }
 0x149   :  { %v683_v20 = vrot.slane %v682_v49, 1  ;;  %v709_v47 = vsel %vm708_vm8, %v706_v52, %v650_v22  ;;  %v710_v16 = vsel %vm708_vm8, %v707_v5, %v656_v39  ;;  %v730_v62 = vsub.s32 1, %v1133_v10 }
 0x14a   :  { %v678_v57 = vadd.f32 %v677_v54, %v676_v46  ;;  %v690_v58 = vadd.f32 %v689_v55, %v688_v43  ;;  %v695_v59 = vrot.slane %v694_v3, 2  ;;  %v712_v60 = vsel %vm711_vm9, %v709_v47, %v664_v45 }
 0x14b   :  { %v684_v56 = vadd.f32 %v683_v20, %v682_v49  ;;  %v713_v61 = vsel %vm711_vm9, %v710_v16, %v670_v48  ;;  %v727_v6 = vrot.slane %v1482_v13, %v726_v53  ;;  %v731_v9 = vrot.slane %v1482_v13, %v730_v62 }
 0x14c   :  { %v691_v63 = vrot.slane %v690_v58, 1  ;;  %v696_v0 = vadd.f32 %v695_v59, %v694_v3  ;;  %v715_v2 = vsel %vm714_vm10, %v712_v60, %v678_v57 }
 0x14d   :  { %v716_v50 = vsel %vm714_vm10, %v713_v61, %v684_v56 }
 0x14e   :  { %v692_v7 = vadd.f32 %v691_v63, %v690_v58  ;;  %v697_v8 = vrot.slane %v696_v0, 1 }
 0x150   :  { %v698_v11 = vadd.f32 %v697_v8, %v696_v0  ;;  %v718_v12 = vsel %vm717_vm11, %v715_v2, %v692_v7 }
 0x151   :  { %v734_v15 = vmul.f32 %v727_v6, %v718_v12  ;;  %v1051_v25 = vpop.eup %1050 }
 0x152   :  { %v719_v17 = vsel %vm717_vm11, %v716_v50, %v698_v11 }
 0x153   :  { %v735_v14 = vmul.f32 %v731_v9, %v719_v17  ;;  %v736_v18 = vadd.f32 %v1049_v1, %v734_v15 }
 0x155   :  { %v737_v19 = vadd.f32 %v1051_v25, %v735_v14  ;;  %738 = vst [vmem:[#allocation2] sm:$0xff] %v736_v18 }
 0x157   :  { %739 = vst [vmem:[#allocation2 + $0x8] sm:$0xff] %v737_v19 }
 0x158   :  { %1063 = shalt.err (!%p1060_p4)
}
 0x159   :  { %s1064_s8 = scalar_lea.hbm %s1536_s5, 256 }
 0x15a   :  { %p1065_p5 = scmp.ne.s32.totalorder %s1536_s5, %s1064_s8  ;;  %p1068_p6 = scmp.lt.u32.totalorder %s1064_s8, %s1536_s5 }
 0x15c   :  { %p1070_p7 = pnand %p1068_p6, %p1065_p5 }
 0x15e   :  { %1073 = shalt.err (!%p1070_p7)
}
 0x15f   :  { %749 = dma.vmem_to_hbm [thread:$0]  %s747_s29, 256, %s1536_s5, [#allocation3]  }
 0x160   :  { %1074 = dma.done.wait [#allocation3], 256  }
 0x161   :  { %1075 = vsyncadd [#allocation3], 4294967040 }
 0x162   :  { %753 = vsyncpa [#allocation3], 1 }

</bundles_post_ra>
